<compile_context>
chip_gen: v7x
topology: tpu7x:2x2x1
jax: 0.10.0
libtpu: 0.0.40
codegen_flags: <defaults>
</compile_context>

<pallas_src>
import functools

import jax
import jax.numpy as jnp
from jax.experimental import pallas as pl
from jax.experimental.pallas import tpu as pltpu


def _cdiv(a, b):
    return (a + b - 1) // b


def _round_up(n, m):
    return ((n + m - 1) // m) * m


def mlp_kernel(x_ref, w1_ref, b1_ref, w2_ref, b2_ref, w3_ref, b3_ref,
               w4_ref, b4_ref, o_ref, *, approx_sigmoid):
    """Feature-major fused MLP: activations are (features, batch_tile).

    Weights are PyTorch-layout (out, in), biases (out, 1); the batch tile sits
    on the lane axis so every elementwise op and the output store is
    lane-dense.  Matmuls accumulate in f32 on the MXU; bias/ReLU/sigmoid run
    in f32 on the VPU/EUP (v5e has no bf16 VPU/EUP).
    """
    cdt = w1_ref.dtype                               # matmul operand dtype

    x = x_ref[...].astype(cdt)                       # (21, tb), cast in-kernel

    h = jnp.dot(w1_ref[...], x, preferred_element_type=jnp.float32)
    h = jnp.maximum(h + b1_ref[...], 0.0)            # (64, tb) f32

    h = jnp.dot(w2_ref[...], h.astype(cdt), preferred_element_type=jnp.float32)
    h = jnp.maximum(h + b2_ref[...], 0.0)            # (64, tb) f32

    h = jnp.dot(w3_ref[...], h.astype(cdt), preferred_element_type=jnp.float32)
    h = jnp.maximum(h + b3_ref[...], 0.0)            # (64, tb) f32

    y = jnp.dot(w4_ref[...], h.astype(cdt), preferred_element_type=jnp.float32)
    y = y + b4_ref[...]                              # (1, tb) f32, lane-dense

    # sigmoid = 1 / (1 + exp(-y)).  exp(-y) saturates to inf / 0 at the
    # extremes, giving the correct limits 0 / 1.  The approximate EUP vrcp is
    # used only on the fast bf16 path; the f32 path does an exact divide.
    denom = 1.0 + jnp.exp(-y)
    if approx_sigmoid:
        o_ref[...] = pl.reciprocal(denom, approx=True)
    else:
        o_ref[...] = 1.0 / denom


def phishing_classifier_forward(x, params, *, tb=4096,
                                matmul_dtype=jnp.bfloat16, num_cores=None):
    """x: (B, 21) f32.  params: PyTorch layout, w{i}: (out, in), b{i}: (out,).

    tb: max batch tile on the lane axis (rounded down to a multiple of 128).
    matmul_dtype: dtype fed to the MXU (bf16 default; f32 for an exact path).
    num_cores: TensorCores per chip; the grid is split across them only if >1.
    """
    B, f_in = x.shape
    assert f_in == 21

    if num_cores is None:
        try:
            num_cores = int(getattr(jax.devices()[0], "num_cores", 1) or 1)
        except Exception:
            num_cores = 1

    # --- batch tiling (lane axis) --------------------------------------------
    tb = max(128, (int(tb) // 128) * 128)
    n_steps = _cdiv(B, tb)
    if num_cores > 1 and B >= 128 * num_cores:
        # Only force extra grid steps when a second TensorCore exists (v7x).
        n_steps = max(n_steps, num_cores)
    tb_eff = _round_up(_cdiv(B, n_steps), 128)       # lane-aligned tile
    B_pad = n_steps * tb_eff                         # <= 127 pad cols per step
    grid = (n_steps,)

    # --- operands --------------------------------------------------------------
    # Single fused pad+transpose to feature-major (21, B_pad); x stays f32 in
    # HBM and is cast to the matmul dtype inside the kernel (no extra HBM pass).
    x_fm = jnp.pad(x, ((0, B_pad - B), (0, 0))).T

    w1 = params["w1"].astype(matmul_dtype)                   # (64, 21)
    w2 = params["w2"].astype(matmul_dtype)                   # (64, 64)
    w3 = params["w3"].astype(matmul_dtype)                   # (64, 64)
    w4 = params["w4"].astype(matmul_dtype)                   # (1, 64)
    b1 = params["b1"].reshape(-1, 1).astype(jnp.float32)     # (64, 1)
    b2 = params["b2"].reshape(-1, 1).astype(jnp.float32)     # (64, 1)
    b3 = params["b3"].reshape(-1, 1).astype(jnp.float32)     # (64, 1)
    b4 = params["b4"].reshape(-1, 1).astype(jnp.float32)     # (1, 1)

    # Weights/biases are grid-invariant: constant (0, 0) block index keeps
    # them resident in VMEM across the whole batch loop.
    full = lambda shape: pl.BlockSpec(shape, lambda i: (0, 0))

    kernel = functools.partial(
        mlp_kernel,
        approx_sigmoid=(jnp.dtype(matmul_dtype) != jnp.dtype(jnp.float32)))

    out = pl.pallas_call(
        kernel,
        out_shape=jax.ShapeDtypeStruct((1, B_pad), jnp.float32),
        grid_spec=pltpu.PrefetchScalarGridSpec(
            num_scalar_prefetch=0,
            grid=grid,
            in_specs=[
                pl.BlockSpec((21, tb_eff), lambda i: (0, i)),   # x (feature-major)
                full((64, 21)), full((64, 1)),                  # layer 1
                full((64, 64)), full((64, 1)),                  # layer 2
                full((64, 64)), full((64, 1)),                  # layer 3
                full((1, 64)),  full((1, 1)),                   # layer 4
            ],
            out_specs=pl.BlockSpec((1, tb_eff), lambda i: (0, i)),
        ),
        compiler_params=pltpu.CompilerParams(
            dimension_semantics=("parallel",),
            vmem_limit_bytes=32 * 1024 * 1024,
        ),
    )(x_fm, w1, b1, w2, b2, w3, b3, w4, b4)

    # Back to the PyTorch (B, 1) output shape; pad columns are dropped.
    return out[0, :B].reshape(B, 1)


def init_params(key):
    """PyTorch-style Linear init: W (out, in), b (out,), U(+-1/sqrt(fan_in))."""
    dims = [(21, 64), (64, 64), (64, 64), (64, 1)]
    params = {}
    for idx, (fan_in, fan_out) in enumerate(dims, start=1):
        key, kw, kb = jax.random.split(key, 3)
        bound = 1.0 / (fan_in ** 0.5)
        params[f"w{idx}"] = jax.random.uniform(
            kw, (fan_out, fan_in), jnp.float32, minval=-bound, maxval=bound)
        params[f"b{idx}"] = jax.random.uniform(
            kb, (fan_out,), jnp.float32, minval=-bound, maxval=bound)
    return params


if __name__ == "__main__":
    key = jax.random.PRNGKey(0)
    k_params, k_x1, k_x2 = jax.random.split(key, 3)

    params = init_params(k_params)

    # Reference in plain JAX (f32, PyTorch weight layout).
    def ref(x, p):
        h = jax.nn.relu(x @ p["w1"].T + p["b1"])
        h = jax.nn.relu(h @ p["w2"].T + p["b2"])
        h = jax.nn.relu(h @ p["w3"].T + p["b3"])
        return jax.nn.sigmoid(h @ p["w4"].T + p["b4"])

    # 1) Lane-aligned batch, exact-precision path (f32 matmuls, exact divide).
    B = 256
    x = jax.random.normal(k_x1, (B, 21), dtype=jnp.float32)
    expected = ref(x, params)

    out_f32 = jax.block_until_ready(
        phishing_classifier_forward(x, params, matmul_dtype=jnp.float32))
    assert out_f32.shape == (B, 1)
    assert jnp.allclose(out_f32, expected, atol=5e-3, rtol=0.0)

    # 2) Default fast path (bf16 MXU operands, f32 accumulation).
    out_bf16 = jax.block_until_ready(phishing_classifier_forward(x, params))
    assert out_bf16.shape == (B, 1)
    assert jnp.allclose(out_bf16, expected, atol=5e-2, rtol=0.0)

    # 3) Ragged batch exercises the pad-to-128 path.
    B2 = 200
    x2 = jax.random.normal(k_x2, (B2, 21), dtype=jnp.float32)
    out2 = jax.block_until_ready(phishing_classifier_forward(x2, params))
    assert out2.shape == (B2, 1)
    assert jnp.allclose(out2, ref(x2, params), atol=5e-2, rtol=0.0)

    print("KERNEL_OK")
</pallas_src>

<mosaic_0001>
module attributes {stable_mosaic.version = 11 : i64} {
  func.func @mlp_kernel(%arg0: i32, %arg1: memref<21x256xf32, #tpu.memory_space<vmem>>, %arg2: memref<64x21xf32, #tpu.memory_space<vmem>>, %arg3: memref<64x1xf32, #tpu.memory_space<vmem>>, %arg4: memref<64x64xf32, #tpu.memory_space<vmem>>, %arg5: memref<64x1xf32, #tpu.memory_space<vmem>>, %arg6: memref<64x64xf32, #tpu.memory_space<vmem>>, %arg7: memref<64x1xf32, #tpu.memory_space<vmem>>, %arg8: memref<1x64xf32, #tpu.memory_space<vmem>>, %arg9: memref<1x1xf32, #tpu.memory_space<vmem>>, %arg10: memref<1x256xf32, #tpu.memory_space<vmem>>) attributes {dimension_semantics = [#tpu.dimension_semantics<parallel>], iteration_bounds = array<i64: 1>, scalar_prefetch = 0 : i64, scratch_operands = 0 : i64, tpu.core_type = #tpu.core_type<tc>, window_params = [{transform_indices = @transform_0, window_bounds = array<i64: 21, 256>}, {pipeline_mode = #tpu.pipeline_mode<synchronous>, transform_indices = @transform_1, window_bounds = array<i64: 64, 21>}, {pipeline_mode = #tpu.pipeline_mode<synchronous>, transform_indices = @transform_2, window_bounds = array<i64: 64, 1>}, {pipeline_mode = #tpu.pipeline_mode<synchronous>, transform_indices = @transform_3, window_bounds = array<i64: 64, 64>}, {pipeline_mode = #tpu.pipeline_mode<synchronous>, transform_indices = @transform_4, window_bounds = array<i64: 64, 1>}, {pipeline_mode = #tpu.pipeline_mode<synchronous>, transform_indices = @transform_5, window_bounds = array<i64: 64, 64>}, {pipeline_mode = #tpu.pipeline_mode<synchronous>, transform_indices = @transform_6, window_bounds = array<i64: 64, 1>}, {pipeline_mode = #tpu.pipeline_mode<synchronous>, transform_indices = @transform_7, window_bounds = array<i64: 1, 64>}, {pipeline_mode = #tpu.pipeline_mode<synchronous>, transform_indices = @transform_8, window_bounds = array<i64: 1, 1>}, {transform_indices = @transform_9, window_bounds = array<i64: 1, 256>}]} {
    %c0 = arith.constant 0 : index
    %c0_0 = arith.constant 0 : index
    %0 = vector.load %arg1[%c0, %c0_0] : memref<21x256xf32, #tpu.memory_space<vmem>>, vector<21x256xf32>
    %c0_1 = arith.constant 0 : index
    %c0_2 = arith.constant 0 : index
    %1 = vector.load %arg2[%c0_1, %c0_2] : memref<64x21xf32, #tpu.memory_space<vmem>>, vector<64x21xf32>
    %cst = arith.constant dense<0.000000e+00> : vector<64x256xf32>
    %2 = tpu.matmul %1, %0, %cst {dimension_numbers = #tpu.dot_dimension_numbers<[1], [0], [0], [1], [0, 0, 1, 1], [], []>} : vector<64x21xf32>, vector<21x256xf32>, vector<64x256xf32> -> vector<64x256xf32>
    %c0_3 = arith.constant 0 : index
    %c0_4 = arith.constant 0 : index
    %3 = vector.load %arg3[%c0_3, %c0_4] : memref<64x1xf32, #tpu.memory_space<vmem>>, vector<64x1xf32>
    %4 = vector.broadcast %3 : vector<64x1xf32> to vector<64x256xf32>
    %5 = arith.addf %2, %4 : vector<64x256xf32>
    %cst_5 = arith.constant 0.000000e+00 : f32
    %6 = vector.broadcast %cst_5 : f32 to vector<64x256xf32>
    %7 = arith.maximumf %5, %6 : vector<64x256xf32>
    %c0_6 = arith.constant 0 : index
    %c0_7 = arith.constant 0 : index
    %8 = vector.load %arg4[%c0_6, %c0_7] : memref<64x64xf32, #tpu.memory_space<vmem>>, vector<64x64xf32>
    %cst_8 = arith.constant dense<0.000000e+00> : vector<64x256xf32>
    %9 = tpu.matmul %8, %7, %cst_8 {dimension_numbers = #tpu.dot_dimension_numbers<[1], [0], [0], [1], [0, 0, 1, 1], [], []>} : vector<64x64xf32>, vector<64x256xf32>, vector<64x256xf32> -> vector<64x256xf32>
    %c0_9 = arith.constant 0 : index
    %c0_10 = arith.constant 0 : index
    %10 = vector.load %arg5[%c0_9, %c0_10] : memref<64x1xf32, #tpu.memory_space<vmem>>, vector<64x1xf32>
    %11 = vector.broadcast %10 : vector<64x1xf32> to vector<64x256xf32>
    %12 = arith.addf %9, %11 : vector<64x256xf32>
    %cst_11 = arith.constant 0.000000e+00 : f32
    %13 = vector.broadcast %cst_11 : f32 to vector<64x256xf32>
    %14 = arith.maximumf %12, %13 : vector<64x256xf32>
    %c0_12 = arith.constant 0 : index
    %c0_13 = arith.constant 0 : index
    %15 = vector.load %arg6[%c0_12, %c0_13] : memref<64x64xf32, #tpu.memory_space<vmem>>, vector<64x64xf32>
    %cst_14 = arith.constant dense<0.000000e+00> : vector<64x256xf32>
    %16 = tpu.matmul %15, %14, %cst_14 {dimension_numbers = #tpu.dot_dimension_numbers<[1], [0], [0], [1], [0, 0, 1, 1], [], []>} : vector<64x64xf32>, vector<64x256xf32>, vector<64x256xf32> -> vector<64x256xf32>
    %c0_15 = arith.constant 0 : index
    %c0_16 = arith.constant 0 : index
    %17 = vector.load %arg7[%c0_15, %c0_16] : memref<64x1xf32, #tpu.memory_space<vmem>>, vector<64x1xf32>
    %18 = vector.broadcast %17 : vector<64x1xf32> to vector<64x256xf32>
    %19 = arith.addf %16, %18 : vector<64x256xf32>
    %cst_17 = arith.constant 0.000000e+00 : f32
    %20 = vector.broadcast %cst_17 : f32 to vector<64x256xf32>
    %21 = arith.maximumf %19, %20 : vector<64x256xf32>
    %c0_18 = arith.constant 0 : index
    %c0_19 = arith.constant 0 : index
    %22 = vector.load %arg8[%c0_18, %c0_19] : memref<1x64xf32, #tpu.memory_space<vmem>>, vector<1x64xf32>
    %cst_20 = arith.constant dense<0.000000e+00> : vector<1x256xf32>
    %23 = tpu.matmul %22, %21, %cst_20 {dimension_numbers = #tpu.dot_dimension_numbers<[1], [0], [0], [1], [0, 0, 1, 1], [], []>} : vector<1x64xf32>, vector<64x256xf32>, vector<1x256xf32> -> vector<1x256xf32>
    %c0_21 = arith.constant 0 : index
    %c0_22 = arith.constant 0 : index
    %24 = vector.load %arg9[%c0_21, %c0_22] : memref<1x1xf32, #tpu.memory_space<vmem>>, vector<1x1xf32>
    %25 = vector.broadcast %24 : vector<1x1xf32> to vector<1x256xf32>
    %26 = arith.addf %23, %25 : vector<1x256xf32>
    %cst_23 = arith.constant 0.000000e+00 : f32
    %27 = vector.broadcast %cst_23 : f32 to vector<1x256xf32>
    %28 = arith.subf %27, %26 : vector<1x256xf32>
    %29 = math.exp %28 : vector<1x256xf32>
    %cst_24 = arith.constant 1.000000e+00 : f32
    %30 = vector.broadcast %cst_24 : f32 to vector<1x256xf32>
    %31 = arith.addf %30, %29 : vector<1x256xf32>
    %cst_25 = arith.constant 1.000000e+00 : f32
    %32 = vector.broadcast %cst_25 : f32 to vector<1x256xf32>
    %33 = arith.divf %32, %31 : vector<1x256xf32>
    %c0_26 = arith.constant 0 : index
    %c0_27 = arith.constant 0 : index
    %34 = vector.load %arg10[%c0_26, %c0_27] : memref<1x256xf32, #tpu.memory_space<vmem>>, vector<1x256xf32>
    tpu.vector_store %arg10[%c0_26, %c0_27], %33 {strides = array<i32>} : memref<1x256xf32, #tpu.memory_space<vmem>>, vector<1x256xf32>,
    return
  }
  func.func @transform_0(%arg0: i32) -> (i32, i32) {
    %c0_i32 = arith.constant 0 : i32
    %c0_i32_0 = arith.constant 0 : i32
    return %c0_i32, %arg0 : i32, i32
  }
  func.func @transform_1(%arg0: i32) -> (i32, i32) {
    %c0_i32 = arith.constant 0 : i32
    %c0_i32_0 = arith.constant 0 : i32
    %c0_i32_1 = arith.constant 0 : i32
    return %c0_i32, %c0_i32_0 : i32, i32
  }
  func.func @transform_2(%arg0: i32) -> (i32, i32) {
    %c0_i32 = arith.constant 0 : i32
    %c0_i32_0 = arith.constant 0 : i32
    %c0_i32_1 = arith.constant 0 : i32
    return %c0_i32, %c0_i32_0 : i32, i32
  }
  func.func @transform_3(%arg0: i32) -> (i32, i32) {
    %c0_i32 = arith.constant 0 : i32
    %c0_i32_0 = arith.constant 0 : i32
    %c0_i32_1 = arith.constant 0 : i32
    return %c0_i32, %c0_i32_0 : i32, i32
  }
  func.func @transform_4(%arg0: i32) -> (i32, i32) {
    %c0_i32 = arith.constant 0 : i32
    %c0_i32_0 = arith.constant 0 : i32
    %c0_i32_1 = arith.constant 0 : i32
    return %c0_i32, %c0_i32_0 : i32, i32
  }
  func.func @transform_5(%arg0: i32) -> (i32, i32) {
    %c0_i32 = arith.constant 0 : i32
    %c0_i32_0 = arith.constant 0 : i32
    %c0_i32_1 = arith.constant 0 : i32
    return %c0_i32, %c0_i32_0 : i32, i32
  }
  func.func @transform_6(%arg0: i32) -> (i32, i32) {
    %c0_i32 = arith.constant 0 : i32
    %c0_i32_0 = arith.constant 0 : i32
    %c0_i32_1 = arith.constant 0 : i32
    return %c0_i32, %c0_i32_0 : i32, i32
  }
  func.func @transform_7(%arg0: i32) -> (i32, i32) {
    %c0_i32 = arith.constant 0 : i32
    %c0_i32_0 = arith.constant 0 : i32
    %c0_i32_1 = arith.constant 0 : i32
    return %c0_i32, %c0_i32_0 : i32, i32
  }
  func.func @transform_8(%arg0: i32) -> (i32, i32) {
    %c0_i32 = arith.constant 0 : i32
    %c0_i32_0 = arith.constant 0 : i32
    %c0_i32_1 = arith.constant 0 : i32
    return %c0_i32, %c0_i32_0 : i32, i32
  }
  func.func @transform_9(%arg0: i32) -> (i32, i32) {
    %c0_i32 = arith.constant 0 : i32
    %c0_i32_0 = arith.constant 0 : i32
    return %c0_i32, %arg0 : i32, i32
  }
}

</mosaic_0001>

<bundles_post_ra>
// kernel: tpu_custom_call.1
= control target key start
LH: loop header
LB: loop body
LE: loop exit
PB: predicated region body
PF: predicated region fallthrough
CT: control target
= control target key end

     0   :  { %s1220_s0 = inlined_call_operand.vmem [shape: f32[21,256], index: 0, kind: input, shape index: {}]   ;;  %s1221_s1 = inlined_call_operand.vmem [shape: f32[64,21], index: 1, kind: input, shape index: {}]   ;;  %s1222_s2 = inlined_call_operand.vmem [shape: f32[64,1], index: 2, kind: input, shape index: {}]   ;;  %s1223_s3 = inlined_call_operand.vmem [shape: f32[64,64], index: 3, kind: input, shape index: {}]   ;;  %s1224_s4 = inlined_call_operand.vmem [shape: f32[64,1], index: 4, kind: input, shape index: {}]   ;;  %s1225_s5 = inlined_call_operand.vmem [shape: f32[64,64], index: 5, kind: input, shape index: {}]   ;;  %s1226_s6 = inlined_call_operand.vmem [shape: f32[64,1], index: 6, kind: input, shape index: {}]   ;;  %s1227_s7 = inlined_call_operand.vmem [shape: f32[1,64], index: 7, kind: input, shape index: {}]   ;;  %s1228_s8 = inlined_call_operand.<no memory space> [shape: f32[1,1], index: 8, kind: input, shape index: {}]   ;;  %s1229_s9 = inlined_call_operand.hbm [shape: f32[1,256], index: 9, kind: output, shape index: {}]  }
   0x1   :  { %v14_v0 = vstv %s1228_s8 }
   0x2   :  { %15 = vst [vmem:[#allocation2] sm:$0x1] %v14_v0 }
   0x3   :  { %v36_v1 = vld [vmem:[%s1220_s0 + $0x8] sm:$0xff]  ;;  %v38_v2 = vld [vmem:[%s1220_s0 + $0x18] sm:$0xff]  ;;  %v35_v3 = vld [vmem:[%s1220_s0] sm:$0xff]  ;;  %v932_v6 = vmov 0.0   ;;  %vm122_vm0 = vcmask 1044480   ;;  %v933_v9 = vmov 0  }
   0x4   :  { %v838_v4 = vpack.c.bf16 %v38_v2, %v36_v1  ;;  %v37_v5 = vld [vmem:[%s1220_s0 + $0x10] sm:$0xff]  ;;  %193 = vmatprep.mubr.f32.mxu0 %v932_v6  ;;  %217 = vmatprep.mubr.f32.mxu1 %v932_v6  ;;  %v40_v8 = vld [vmem:[%s1220_s0 + $0x28] sm:$0x1f]  ;;  %v49_v10 = vld [vmem:[%s1222_s2] sm:$0xff]  ;;  %vm97_vm1 = vcmask 171008  }
   0x5   :  { %v840_v7 = vpack.c.bf16 %v37_v5, %v35_v3  ;;  %898 = vset.pattern.permute.xlu0 %v933_v9  ;;  %899 = vset.pattern.permute.xlu1 %v933_v9  ;;  %v39_v11 = vld [vmem:[%s1220_s0 + $0x20] sm:$0x1f]  ;;  %v51_v12 = vld [vmem:[%s1222_s2 + $0x10] sm:$0xff]  ;;  %v50_v15 = vld [vmem:[%s1222_s2 + $0x8] sm:$0xff] }
   0x6   :  { %839 = vmatprep.subr.bf16.mxu0 %v838_v4  ;;  %890 = vmatprep.subr.bf16.mxu1 %v838_v4  ;;  %v41_v13 = vld [vmem:[%s1221_s1] sm:$0xff]  ;;  %v52_v16 = vld [vmem:[%s1222_s2 + $0x18] sm:$0xff]  ;;  %v42_v17 = vld [vmem:[%s1221_s1 + $0x8] sm:$0xff] }
   0x7   :  { %841 = vmatpush1.bf16.msra.mxu0 %v840_v7  ;;  %892 = vmatpush1.bf16.msra.mxu1 %v840_v7  ;;  %v45_v14 = vld [vmem:[%s1221_s1 + $0x20] sm:$0xff]  ;;  %v46_v18 = vld [vmem:[%s1221_s1 + $0x28] sm:$0xff] }
   0x8   :  { %811 = vmatprep.subr.msk.mxu0 %vm122_vm0, %v40_v8  ;;  %891 = vmatprep.subr.msk.mxu1 %vm122_vm0, %v40_v8  ;;  %v53_v19 = vld [vmem:[%s1222_s2 + $0x20] sm:$0xff]  ;;  %v54_v20 = vld [vmem:[%s1222_s2 + $0x28] sm:$0xff] }
   0x9   :  { %59 = vperm.xlu0 %898, %v49_v10   ;;  %69 = vperm.xlu1 %899, %v51_v12  }
   0xb   :  { %812 = vmatpush1.msk.msra.mxu0 %vm122_vm0, %v39_v11  ;;  %893 = vmatpush1.msk.msra.mxu1 %vm122_vm0, %v39_v11 }
   0xc   :  { %813 = vmatmul.mubr.msk.f32.vlgmr.msra.gmra.mrb[0].mxu0 %vm97_vm1, %v41_v13  ;;  %817 = vmatmul.mubr.msk.f32.vlgmr.msra.gmra.mrb[0].mxu1 %vm97_vm1, %v45_v14 }
   0xd   :  { %199 = vmatprep.mubr.f32.mxu0 %v932_v6  ;;  %223 = vmatprep.mubr.f32.mxu1 %v932_v6 }
   0xe   :  { %64 = vperm.xlu0 %898, %v50_v15   ;;  %74 = vperm.xlu1 %899, %v52_v16  }
  0x10   :  { %814 = vmatmul.mubr.msk.f32.gmra.mrb[2].mxu0 %vm97_vm1, %v42_v17  ;;  %818 = vmatmul.mubr.msk.f32.gmra.mrb[2].mxu1 %vm97_vm1, %v46_v18 }
  0x11   :  { %16 = vsyncpa [#allocation4], 0  ;;  %205 = vmatprep.mubr.f32.mxu0 %v932_v6  ;;  %229 = vmatprep.mubr.f32.mxu1 %v932_v6  ;;  %v43_v21 = vld [vmem:[%s1221_s1 + $0x10] sm:$0xff]  ;;  %v56_v24 = vld [vmem:[%s1222_s2 + $0x38] sm:$0xff]  ;;  %vm314_vm2 = vcmask 523264  }
  0x12   :  { %v47_v22 = vld [vmem:[%s1221_s1 + $0x30] sm:$0xff]  ;;  %79 = vperm.xlu0 %898, %v53_v19   ;;  %84 = vperm.xlu1 %899, %v54_v20   ;;  %v44_v25 = vld [vmem:[%s1221_s1 + $0x18] sm:$0xff]  ;;  %v266_v27 = vld [vmem:[%s1224_s4] sm:$0xff] }
  0x13   :  { %v55_v23 = vld [vmem:[%s1222_s2 + $0x30] sm:$0xff]  ;;  %v48_v26 = vld [vmem:[%s1221_s1 + $0x38] sm:$0xff]  ;;  %v267_v28 = vld [vmem:[%s1224_s4 + $0x8] sm:$0xff] }
  0x14   :  { %815 = vmatmul.mubr.msk.f32.gmra.mrb[4].mxu0 %vm97_vm1, %v43_v21  ;;  %819 = vmatmul.mubr.msk.f32.gmra.mrb[4].mxu1 %vm97_vm1, %v47_v22  ;;  %v268_v29 = vld [vmem:[%s1224_s4 + $0x10] sm:$0xff]  ;;  %v269_v30 = vld [vmem:[%s1224_s4 + $0x18] sm:$0xff]  ;;  %v270_v31 = vld [vmem:[%s1224_s4 + $0x20] sm:$0xff] }
  0x15   :  { %211 = vmatprep.mubr.f32.mxu0 %v932_v6  ;;  %235 = vmatprep.mubr.f32.mxu1 %v932_v6  ;;  %v271_v32 = vld [vmem:[%s1224_s4 + $0x28] sm:$0xff]  ;;  %v272_v33 = vld [vmem:[%s1224_s4 + $0x30] sm:$0xff]  ;;  %v273_v34 = vld [vmem:[%s1224_s4 + $0x38] sm:$0xff] }
  0x16   :  { %89 = vperm.xlu0 %898, %v55_v23   ;;  %94 = vperm.xlu1 %899, %v56_v24   ;;  %v476_v35 = vld [vmem:[%s1226_s6] sm:$0xff]  ;;  %v477_v36 = vld [vmem:[%s1226_s6 + $0x8] sm:$0xff]  ;;  %v478_v37 = vld [vmem:[%s1226_s6 + $0x10] sm:$0xff] }
  0x17   :  { %v479_v38 = vld [vmem:[%s1226_s6 + $0x18] sm:$0xff]  ;;  %v480_v39 = vld [vmem:[%s1226_s6 + $0x20] sm:$0xff]  ;;  %v481_v40 = vld [vmem:[%s1226_s6 + $0x28] sm:$0xff] }
  0x18   :  { %816 = vmatmul.mubr.msk.f32.gmra.mrb[6].mxu0 %vm97_vm1, %v44_v25  ;;  %820 = vmatmul.mubr.msk.f32.gmra.mrb[6].mxu1 %vm97_vm1, %v48_v26  ;;  %v482_v41 = vld [vmem:[%s1226_s6 + $0x30] sm:$0xff]  ;;  %v483_v42 = vld [vmem:[%s1226_s6 + $0x38] sm:$0xff]  ;;  %v678_v43 = vld [vmem:[#allocation2] sm:$0x1] }
  0x19   :  { %403 = vmatprep.mubr.f32.mxu1 %v932_v6  ;;  %612 = vmatprep.mubr.f32.mxu0 %v932_v6 }
  0x1a   :  { %276 = vperm.xlu0 %898, %v266_v27   ;;  %281 = vperm.xlu1 %899, %v267_v28  }
  0x1e   :  { %286 = vperm.xlu0 %898, %v268_v29   ;;  %291 = vperm.xlu1 %899, %v269_v30  }
  0x22   :  { %296 = vperm.xlu0 %898, %v270_v31   ;;  %301 = vperm.xlu1 %899, %v271_v32  }
  0x26   :  { %306 = vperm.xlu0 %898, %v272_v33   ;;  %311 = vperm.xlu1 %899, %v273_v34  }
  0x2a   :  { %486 = vperm.xlu0 %898, %v476_v35   ;;  %491 = vperm.xlu1 %899, %v477_v36  }
  0x2e   :  { %496 = vperm.xlu0 %898, %v478_v37   ;;  %501 = vperm.xlu1 %899, %v479_v38  }
  0x32   :  { %506 = vperm.xlu0 %898, %v480_v39   ;;  %511 = vperm.xlu1 %899, %v481_v40  }
  0x36   :  { %516 = vperm.xlu0 %898, %v482_v41   ;;  %521 = vperm.xlu1 %899, %v483_v42  }
  0x3a   :  { %681 = vperm.xlu0 %898, %v678_v43  }
  0x88   :  { %v60_v44 = vpop.permute.xlu0 %59  ;;  %v70_v45 = vpop.permute.xlu1 %69 }
  0x8d   :  { %v65_v46 = vpop.permute.xlu0 %64  ;;  %v75_v47 = vpop.permute.xlu1 %74 }
  0x91   :  { %v80_v48 = vpop.permute.xlu0 %79  ;;  %v85_v55 = vpop.permute.xlu1 %84 }
  0x95   :  { %v90_v17 = vpop.permute.xlu0 %89  ;;  %v95_v20 = vpop.permute.xlu1 %94 }
  0xdf   :  { %v195_v49 = vpop.f32.mrb[0].mxu0  ;;  %v219_v50 = vpop.f32.mrb[0].mxu1 }
  0xe0   :  { %v197_v51 = vpop.f32.mrb[1].mxu0  ;;  %v220_v52 = vadd.f32 %v219_v50, %v80_v48  ;;  %v221_v53 = vpop.f32.mrb[1].mxu1  ;;  %v196_v56 = vadd.f32 %v195_v49, %v60_v44  ;;  %v262_v49 = vld [vmem:[%s1223_s3 + $0x20] sm:$0xff]  ;;  %v263_v50 = vld [vmem:[%s1223_s3 + $0x28] sm:$0xff] }
  0xe1   :  { %v222_v54 = vadd.f32 %v221_v53, %v80_v48  ;;  %v198_v57 = vadd.f32 %v197_v51, %v60_v44  ;;  %v261_v48 = vld [vmem:[%s1223_s3 + $0x18] sm:$0xff]  ;;  %v264_v51 = vld [vmem:[%s1223_s3 + $0x30] sm:$0xff] }
  0xe2   :  { %v250_v60 = vmax.f32 %v220_v52, 0.0  ;;  %v242_v4 = vmax.f32 %v196_v56, 0.0  ;;  %v265_v52 = vld [vmem:[%s1223_s3 + $0x38] sm:$0xff] }
  0xe3   :  { %v201_v58 = vpop.f32.mrb[2].mxu0  ;;  %v225_v59 = vpop.f32.mrb[2].mxu1  ;;  %v251_v1 = vmax.f32 %v222_v54, 0.0  ;;  %v243_v8 = vmax.f32 %v198_v57, 0.0 }
  0xe4   :  { %v202_v61 = vadd.f32 %v201_v58, %v65_v46  ;;  %v226_v62 = vadd.f32 %v225_v59, %v85_v55  ;;  %v203_v63 = vpop.f32.mrb[3].mxu0  ;;  %v227_v0 = vpop.f32.mrb[3].mxu1 }
  0xe5   :  { %v204_v2 = vadd.f32 %v203_v63, %v65_v46  ;;  %v228_v3 = vadd.f32 %v227_v0, %v85_v55  ;;  %v259_v46 = vld [vmem:[%s1223_s3 + $0x8] sm:$0xff]  ;;  %v277_v55 = vpop.permute.xlu0 %276  ;;  %v282_v57 = vpop.permute.xlu1 %281 }
  0xe6   :  { %v244_v5 = vmax.f32 %v202_v61, 0.0  ;;  %v252_v7 = vmax.f32 %v226_v62, 0.0 }
  0xe7   :  { %v245_v9 = vmax.f32 %v204_v2, 0.0  ;;  %v253_v10 = vmax.f32 %v228_v3, 0.0  ;;  %v207_v11 = vpop.f32.mrb[4].mxu0  ;;  %v231_v12 = vpop.f32.mrb[4].mxu1 }
  0xe8   :  { %v844_v13 = vpack.c.bf16 %v244_v5, %v242_v4  ;;  %v852_v14 = vpack.c.bf16 %v252_v7, %v250_v60  ;;  %v209_v15 = vpop.f32.mrb[5].mxu0  ;;  %v233_v16 = vpop.f32.mrb[5].mxu1  ;;  %v208_v21 = vadd.f32 %v207_v11, %v70_v45  ;;  %v232_v22 = vadd.f32 %v231_v12, %v90_v17 }
  0xe9   :  { %v842_v18 = vpack.c.bf16 %v245_v9, %v243_v8  ;;  %v850_v19 = vpack.c.bf16 %v253_v10, %v251_v1  ;;  %v210_v23 = vadd.f32 %v209_v15, %v70_v45  ;;  %v234_v24 = vadd.f32 %v233_v16, %v90_v17  ;;  %v258_v45 = vld [vmem:[%s1223_s3] sm:$0xff]  ;;  %v287_v7 = vpop.permute.xlu0 %286  ;;  %v292_v10 = vpop.permute.xlu1 %291 }
  0xea   :  { %v246_v33 = vmax.f32 %v208_v21, 0.0  ;;  %v254_v34 = vmax.f32 %v232_v22, 0.0 }
  0xeb   :  { %v213_v25 = vpop.f32.mrb[6].mxu0  ;;  %v237_v26 = vpop.f32.mrb[6].mxu1  ;;  %843 = vmatprep.subr.bf16.mxu1 %v842_v18  ;;  %v247_v37 = vmax.f32 %v210_v23, 0.0  ;;  %v255_v38 = vmax.f32 %v234_v24, 0.0 }
  0xec   :  { %v214_v27 = vadd.f32 %v213_v25, %v75_v47  ;;  %v238_v28 = vadd.f32 %v237_v26, %v95_v20  ;;  %v215_v29 = vpop.f32.mrb[7].mxu0  ;;  %v239_v30 = vpop.f32.mrb[7].mxu1  ;;  %845 = vmatpush1.bf16.msra.mxu1 %v844_v13 }
  0xed   :  { %v216_v31 = vadd.f32 %v215_v29, %v75_v47  ;;  %v240_v32 = vadd.f32 %v239_v30, %v95_v20  ;;  %v260_v47 = vld [vmem:[%s1223_s3 + $0x10] sm:$0xff]  ;;  %v297_v23 = vpop.permute.xlu0 %296  ;;  %v302_v26 = vpop.permute.xlu1 %301 }
  0xee   :  { %v248_v35 = vmax.f32 %v214_v27, 0.0  ;;  %v256_v36 = vmax.f32 %v238_v28, 0.0 }
  0xef   :  { %v249_v39 = vmax.f32 %v216_v31, 0.0  ;;  %v257_v40 = vmax.f32 %v240_v32, 0.0 }
  0xf0   :  { %v848_v41 = vpack.c.bf16 %v248_v35, %v246_v33  ;;  %v856_v42 = vpack.c.bf16 %v256_v36, %v254_v34 }
  0xf1   :  { %v846_v43 = vpack.c.bf16 %v249_v39, %v247_v37  ;;  %v854_v44 = vpack.c.bf16 %v257_v40, %v255_v38  ;;  %v307_v39 = vpop.permute.xlu0 %306 }
  0xf3   :  { %847 = vmatprep.subr.bf16.mxu1 %v846_v43 }
  0xf4   :  { %849 = vmatpush1.bf16.msra.mxu1 %v848_v41 }
  0xf5   :  { %851 = vmatprep.subr.bf16.mxu1 %v850_v19 }
  0xf8   :  { %853 = vmatpush1.bf16.msra.mxu1 %v852_v14 }
  0xf9   :  { %855 = vmatprep.subr.bf16.mxu1 %v854_v44 }
  0xfc   :  { %857 = vmatpush1.bf16.msra.mxu1 %v856_v42  ;;  %v312_v42 = vpop.permute.xlu1 %311 }
  0xff   :  { %821 = vmatmul.mubr.msk.f32.vlgmr.msra.gmra.mrb[8].mxu1 %vm314_vm2, %v258_v45 }
 0x100   :  { %409 = vmatprep.mubr.f32.mxu1 %v932_v6 }
 0x103   :  { %822 = vmatmul.mubr.msk.f32.gmra.mrb[10].mxu1 %vm314_vm2, %v259_v46 }
 0x104   :  { %415 = vmatprep.mubr.f32.mxu1 %v932_v6 }
 0x107   :  { %823 = vmatmul.mubr.msk.f32.gmra.mrb[12].mxu1 %vm314_vm2, %v260_v47 }
 0x108   :  { %421 = vmatprep.mubr.f32.mxu1 %v932_v6 }
 0x10b   :  { %824 = vmatmul.mubr.msk.f32.gmra.mrb[14].mxu1 %vm314_vm2, %v261_v48 }
 0x10c   :  { %427 = vmatprep.mubr.f32.mxu1 %v932_v6 }
 0x10f   :  { %825 = vmatmul.mubr.msk.f32.gmra.mrb[16].mxu1 %vm314_vm2, %v262_v49 }
 0x110   :  { %433 = vmatprep.mubr.f32.mxu1 %v932_v6 }
 0x113   :  { %826 = vmatmul.mubr.msk.f32.gmra.mrb[18].mxu1 %vm314_vm2, %v263_v50 }
 0x114   :  { %439 = vmatprep.mubr.f32.mxu1 %v932_v6 }
 0x117   :  { %827 = vmatmul.mubr.msk.f32.gmra.mrb[20].mxu1 %vm314_vm2, %v264_v51 }
 0x118   :  { %445 = vmatprep.mubr.f32.mxu1 %v932_v6 }
 0x11b   :  { %828 = vmatmul.mubr.msk.f32.gmra.mrb[22].mxu1 %vm314_vm2, %v265_v52 }
 0x11c   :  { %755 = vmatprep.mubr.f32.mxu1 %v932_v6 }
 0x1d2   :  { %v405_v53 = vpop.f32.mrb[8].mxu1 }
 0x1d3   :  { %v407_v54 = vpop.f32.mrb[9].mxu1  ;;  %v406_v56 = vadd.f32 %v405_v53, %v277_v55 }
 0x1d4   :  { %v408_v58 = vadd.f32 %v407_v54, %v277_v55  ;;  %v468_v54 = vld [vmem:[%s1225_s5] sm:$0xff]  ;;  %v469_v55 = vld [vmem:[%s1225_s5 + $0x8] sm:$0xff] }
 0x1d5   :  { %v452_v63 = vmax.f32 %v406_v56, 0.0  ;;  %v470_v56 = vld [vmem:[%s1225_s5 + $0x10] sm:$0xff] }
 0x1d6   :  { %v411_v59 = vpop.f32.mrb[10].mxu1  ;;  %v453_v1 = vmax.f32 %v408_v58, 0.0  ;;  %v472_v58 = vld [vmem:[%s1225_s5 + $0x20] sm:$0xff] }
 0x1d7   :  { %v412_v60 = vadd.f32 %v411_v59, %v282_v57  ;;  %v413_v61 = vpop.f32.mrb[11].mxu1  ;;  %v473_v59 = vld [vmem:[%s1225_s5 + $0x28] sm:$0xff] }
 0x1d8   :  { %v414_v62 = vadd.f32 %v413_v61, %v282_v57  ;;  %v471_v57 = vld [vmem:[%s1225_s5 + $0x18] sm:$0xff] }
 0x1d9   :  { %v454_v0 = vmax.f32 %v412_v60, 0.0  ;;  %v474_v60 = vld [vmem:[%s1225_s5 + $0x30] sm:$0xff]  ;;  %v475_v61 = vld [vmem:[%s1225_s5 + $0x38] sm:$0xff] }
 0x1da   :  { %v455_v2 = vmax.f32 %v414_v62, 0.0  ;;  %v417_v3 = vpop.f32.mrb[12].mxu1 }
 0x1db   :  { %v860_v4 = vpack.c.bf16 %v454_v0, %v452_v63  ;;  %v419_v5 = vpop.f32.mrb[13].mxu1  ;;  %v418_v9 = vadd.f32 %v417_v3, %v287_v7  ;;  %v487_v0 = vpop.permute.xlu0 %486 }
 0x1dc   :  { %v858_v8 = vpack.c.bf16 %v455_v2, %v453_v1  ;;  %v420_v11 = vadd.f32 %v419_v5, %v287_v7  ;;  %v492_v2 = vpop.permute.xlu1 %491 }
 0x1dd   :  { %v456_v16 = vmax.f32 %v418_v9, 0.0 }
 0x1de   :  { %v423_v12 = vpop.f32.mrb[14].mxu1  ;;  %859 = vmatprep.subr.bf16.mxu0 %v858_v8  ;;  %v457_v18 = vmax.f32 %v420_v11, 0.0 }
 0x1df   :  { %v424_v13 = vadd.f32 %v423_v12, %v292_v10  ;;  %v425_v14 = vpop.f32.mrb[15].mxu1  ;;  %861 = vmatpush1.bf16.msra.mxu0 %v860_v4 }
 0x1e0   :  { %v426_v15 = vadd.f32 %v425_v14, %v292_v10 }
 0x1e1   :  { %v458_v17 = vmax.f32 %v424_v13, 0.0 }
 0x1e2   :  { %v459_v19 = vmax.f32 %v426_v15, 0.0  ;;  %v429_v20 = vpop.f32.mrb[16].mxu1  ;;  %v497_v15 = vpop.permute.xlu0 %496 }
 0x1e3   :  { %v864_v21 = vpack.c.bf16 %v458_v17, %v456_v16  ;;  %v431_v22 = vpop.f32.mrb[17].mxu1  ;;  %v430_v25 = vadd.f32 %v429_v20, %v297_v23 }
 0x1e4   :  { %v862_v24 = vpack.c.bf16 %v459_v19, %v457_v18  ;;  %v432_v27 = vadd.f32 %v431_v22, %v297_v23  ;;  %v502_v18 = vpop.permute.xlu1 %501 }
 0x1e5   :  { %v460_v32 = vmax.f32 %v430_v25, 0.0 }
 0x1e6   :  { %v435_v28 = vpop.f32.mrb[18].mxu1  ;;  %863 = vmatprep.subr.bf16.mxu0 %v862_v24  ;;  %v461_v34 = vmax.f32 %v432_v27, 0.0 }
 0x1e7   :  { %v436_v29 = vadd.f32 %v435_v28, %v302_v26  ;;  %v437_v30 = vpop.f32.mrb[19].mxu1  ;;  %865 = vmatpush1.bf16.msra.mxu0 %v864_v21 }
 0x1e8   :  { %v438_v31 = vadd.f32 %v437_v30, %v302_v26 }
 0x1e9   :  { %v462_v33 = vmax.f32 %v436_v29, 0.0 }
 0x1ea   :  { %v463_v35 = vmax.f32 %v438_v31, 0.0  ;;  %v441_v36 = vpop.f32.mrb[20].mxu1  ;;  %v507_v31 = vpop.permute.xlu0 %506 }
 0x1eb   :  { %v868_v37 = vpack.c.bf16 %v462_v33, %v460_v32  ;;  %v443_v38 = vpop.f32.mrb[21].mxu1  ;;  %v442_v41 = vadd.f32 %v441_v36, %v307_v39 }
 0x1ec   :  { %v866_v40 = vpack.c.bf16 %v463_v35, %v461_v34  ;;  %v444_v43 = vadd.f32 %v443_v38, %v307_v39  ;;  %v512_v34 = vpop.permute.xlu1 %511 }
 0x1ed   :  { %v464_v48 = vmax.f32 %v442_v41, 0.0 }
 0x1ee   :  { %v447_v44 = vpop.f32.mrb[22].mxu1  ;;  %867 = vmatprep.subr.bf16.mxu0 %v866_v40  ;;  %v465_v50 = vmax.f32 %v444_v43, 0.0 }
 0x1ef   :  { %v448_v45 = vadd.f32 %v447_v44, %v312_v42  ;;  %v449_v46 = vpop.f32.mrb[23].mxu1  ;;  %869 = vmatpush1.bf16.msra.mxu0 %v868_v37 }
 0x1f0   :  { %v450_v47 = vadd.f32 %v449_v46, %v312_v42 }
 0x1f1   :  { %v466_v49 = vmax.f32 %v448_v45, 0.0 }
 0x1f2   :  { %v467_v51 = vmax.f32 %v450_v47, 0.0  ;;  %v517_v47 = vpop.permute.xlu0 %516 }
 0x1f3   :  { %v872_v52 = vpack.c.bf16 %v466_v49, %v464_v48 }
 0x1f4   :  { %v870_v53 = vpack.c.bf16 %v467_v51, %v465_v50  ;;  %v522_v50 = vpop.permute.xlu1 %521 }
 0x1f6   :  { %871 = vmatprep.subr.bf16.mxu0 %v870_v53 }
 0x1f7   :  { %873 = vmatpush1.bf16.msra.mxu0 %v872_v52 }
 0x1fa   :  { %829 = vmatmul.mubr.msk.f32.vlgmr.msra.gmra.mrb[8].mxu0 %vm314_vm2, %v468_v54 }
 0x1fb   :  { %618 = vmatprep.mubr.f32.mxu0 %v932_v6 }
 0x1fe   :  { %830 = vmatmul.mubr.msk.f32.gmra.mrb[10].mxu0 %vm314_vm2, %v469_v55 }
 0x1ff   :  { %624 = vmatprep.mubr.f32.mxu0 %v932_v6 }
 0x202   :  { %831 = vmatmul.mubr.msk.f32.gmra.mrb[12].mxu0 %vm314_vm2, %v470_v56 }
 0x203   :  { %630 = vmatprep.mubr.f32.mxu0 %v932_v6 }
 0x206   :  { %832 = vmatmul.mubr.msk.f32.gmra.mrb[14].mxu0 %vm314_vm2, %v471_v57 }
 0x207   :  { %636 = vmatprep.mubr.f32.mxu0 %v932_v6 }
 0x20a   :  { %833 = vmatmul.mubr.msk.f32.gmra.mrb[16].mxu0 %vm314_vm2, %v472_v58 }
 0x20b   :  { %642 = vmatprep.mubr.f32.mxu0 %v932_v6 }
 0x20e   :  { %834 = vmatmul.mubr.msk.f32.gmra.mrb[18].mxu0 %vm314_vm2, %v473_v59 }
 0x20f   :  { %648 = vmatprep.mubr.f32.mxu0 %v932_v6 }
 0x212   :  { %835 = vmatmul.mubr.msk.f32.gmra.mrb[20].mxu0 %vm314_vm2, %v474_v60 }
 0x213   :  { %654 = vmatprep.mubr.f32.mxu0 %v932_v6 }
 0x216   :  { %836 = vmatmul.mubr.msk.f32.gmra.mrb[22].mxu0 %vm314_vm2, %v475_v61 }
 0x2cd   :  { %v614_v62 = vpop.f32.mrb[8].mxu0 }
 0x2ce   :  { %v616_v63 = vpop.f32.mrb[9].mxu0  ;;  %v615_v1 = vadd.f32 %v614_v62, %v487_v0  ;;  %v677_v62 = vld [vmem:[%s1227_s7] sm:$0x1]  ;;  %s935_s7 = smov [#allocation3]  }
 0x2cf   :  { %v617_v3 = vadd.f32 %v616_v63, %v487_v0  ;;  %v684_v63 = vlaneseq  ;;  %s803_s17 = sshll.u32 %s935_s7, 4  ;;  %s804_s17 = int_to_ptr.vmem [resolvable:$true] %s803_s17 }
 0x2d0   :  { %v661_v9 = vmax.f32 %v615_v1, 0.0  ;;  %s908_s18 = scalar_lea.vmem %s804_s17, 32  ;;  %p913_p1 = scmp.lt.s32.totalorder %s804_s17, %s804_s17 }
 0x2d1   :  { %v620_v4 = vpop.f32.mrb[10].mxu0  ;;  %v662_v11 = vmax.f32 %v617_v3, 0.0  ;;  %v685_v0 = vshrl.u32 %v684_v63, 7  ;;  %vm794_vm3 = vcmp.lt.s32.totalorder %v684_v63, 256  ;;  %p909_p0 = scmp.ne.s32.totalorder %s804_s17, %s908_s18  ;;  %p914_p2 = scmp.lt.s32.totalorder %s908_s18, %s908_s18 }
 0x2d2   :  { %v621_v5 = vadd.f32 %v620_v4, %v492_v2  ;;  %v622_v7 = vpop.f32.mrb[11].mxu0 }
 0x2d3   :  { %v623_v8 = vadd.f32 %v622_v7, %v492_v2  ;;  %v686_v1 = vsub.s32 0, %v685_v0  ;;  %v682_v2 = vpop.permute.xlu0 %681  ;;  %p915_p3 = por %p914_p2, %p913_p1 }
 0x2d4   :  { %v663_v10 = vmax.f32 %v621_v5, 0.0 }
 0x2d5   :  { %v664_v6 = vmax.f32 %v623_v8, 0.0  ;;  %v626_v12 = vpop.f32.mrb[12].mxu0  ;;  %v687_v3 = vrot.slane %v682_v2, %v686_v1  ;;  %p916_p4 = pnand %p915_p3, %p909_p0 }
 0x2d6   :  { %v876_v13 = vpack.c.bf16 %v663_v10, %v661_v9  ;;  %v628_v14 = vpop.f32.mrb[13].mxu0  ;;  %v627_v17 = vadd.f32 %v626_v12, %v497_v15 }
 0x2d7   :  { %v874_v16 = vpack.c.bf16 %v664_v6, %v662_v11  ;;  %v629_v19 = vadd.f32 %v628_v14, %v497_v15 }
 0x2d8   :  { %v665_v24 = vmax.f32 %v627_v17, 0.0 }
 0x2d9   :  { %v632_v20 = vpop.f32.mrb[14].mxu0  ;;  %875 = vmatprep.subr.bf16.mxu1 %v874_v16  ;;  %v666_v26 = vmax.f32 %v629_v19, 0.0  ;;  %v934_v16 = vmov 1966171168  }
 0x2da   :  { %v633_v21 = vadd.f32 %v632_v20, %v502_v18  ;;  %v634_v22 = vpop.f32.mrb[15].mxu0  ;;  %877 = vmatpush1.bf16.msra.mxu1 %v876_v13  ;;  %v778_v17 = vunpack.c.l.s4 %v934_v16 }
 0x2db   :  { %v635_v23 = vadd.f32 %v634_v22, %v502_v18 }
 0x2dc   :  { %v667_v25 = vmax.f32 %v633_v21, 0.0  ;;  %v779_v18 = vunpack.c.0.s8 %v778_v17 }
 0x2dd   :  { %v668_v27 = vmax.f32 %v635_v23, 0.0  ;;  %v638_v28 = vpop.f32.mrb[16].mxu0 }
 0x2de   :  { %v880_v29 = vpack.c.bf16 %v667_v25, %v665_v24  ;;  %v640_v30 = vpop.f32.mrb[17].mxu0  ;;  %v639_v33 = vadd.f32 %v638_v28, %v507_v31  ;;  %v782_v20 = vsub.s32 %v779_v18, %v685_v0 }
 0x2df   :  { %v878_v32 = vpack.c.bf16 %v668_v27, %v666_v26  ;;  %v641_v35 = vadd.f32 %v640_v30, %v507_v31 }
 0x2e0   :  { %v669_v40 = vmax.f32 %v639_v33, 0.0 }
 0x2e1   :  { %v644_v36 = vpop.f32.mrb[18].mxu0  ;;  %879 = vmatprep.subr.bf16.mxu1 %v878_v32  ;;  %v670_v42 = vmax.f32 %v641_v35, 0.0 }
 0x2e2   :  { %v645_v37 = vadd.f32 %v644_v36, %v512_v34  ;;  %v646_v38 = vpop.f32.mrb[19].mxu0  ;;  %881 = vmatpush1.bf16.msra.mxu1 %v880_v29 }
 0x2e3   :  { %v647_v39 = vadd.f32 %v646_v38, %v512_v34 }
 0x2e4   :  { %v671_v41 = vmax.f32 %v645_v37, 0.0 }
 0x2e5   :  { %v672_v43 = vmax.f32 %v647_v39, 0.0  ;;  %v650_v44 = vpop.f32.mrb[20].mxu0 }
 0x2e6   :  { %v884_v45 = vpack.c.bf16 %v671_v41, %v669_v40  ;;  %v652_v46 = vpop.f32.mrb[21].mxu0  ;;  %v651_v49 = vadd.f32 %v650_v44, %v517_v47 }
 0x2e7   :  { %v882_v48 = vpack.c.bf16 %v672_v43, %v670_v42  ;;  %v653_v51 = vadd.f32 %v652_v46, %v517_v47 }
 0x2e8   :  { %v673_v56 = vmax.f32 %v651_v49, 0.0 }
 0x2e9   :  { %v656_v52 = vpop.f32.mrb[22].mxu0  ;;  %883 = vmatprep.subr.bf16.mxu1 %v882_v48  ;;  %v674_v58 = vmax.f32 %v653_v51, 0.0 }
 0x2ea   :  { %v657_v53 = vadd.f32 %v656_v52, %v522_v50  ;;  %v658_v54 = vpop.f32.mrb[23].mxu0  ;;  %885 = vmatpush1.bf16.msra.mxu1 %v884_v45 }
 0x2eb   :  { %v659_v55 = vadd.f32 %v658_v54, %v522_v50 }
 0x2ec   :  { %v675_v57 = vmax.f32 %v657_v53, 0.0 }
 0x2ed   :  { %v676_v59 = vmax.f32 %v659_v55, 0.0 }
 0x2ee   :  { %v888_v60 = vpack.c.bf16 %v675_v57, %v673_v56 }
 0x2ef   :  { %v886_v61 = vpack.c.bf16 %v676_v59, %v674_v58 }
 0x2f1   :  { %887 = vmatprep.subr.bf16.mxu1 %v886_v61 }
 0x2f2   :  { %889 = vmatpush1.bf16.msra.mxu1 %v888_v60 }
 0x2f5   :  { %837 = vmatmul.mubr.msk.f32.vlgmr.msra.gmra.mrb[24].mxu1 %vm314_vm2, %v677_v62 }
 0x3c8   :  { %v757_v4 = vpop.f32.mrb[24].mxu1 }
 0x3c9   :  { %v758_v5 = vadd.f32 %v757_v4, %v687_v3  ;;  %v759_v7 = vpop.f32.mrb[25].mxu1 }
 0x3ca   :  { %v760_v8 = vadd.f32 %v759_v7, %v687_v3 }
 0x3cb   :  { %v762_v9 = vsub.f32 0.0, %v758_v5 }
 0x3cc   :  { %v763_v10 = vsub.f32 0.0, %v760_v8 }
 0x3cd   :  { %v764_v11 = vmul.f32 1.442695, %v762_v9 }
 0x3ce   :  { %v766_v6 = vmul.f32 1.442695, %v763_v10 }
 0x3cf   :  { %900 = vpow2.f32 %v764_v11 }
 0x3d0   :  { %902 = vpow2.f32 %v766_v6 }
 0x3d9   :  { %v901_v12 = vpop.eup %900 }
 0x3da   :  { %v903_v13 = vpop.eup %902  ;;  %v768_v14 = vadd.f32 1.0, %v901_v12 }
 0x3db   :  { %v769_v15 = vadd.f32 1.0, %v903_v13 }
 0x3dc   :  { %904 = vrcp.f32 %v768_v14 }
 0x3dd   :  { %906 = vrcp.f32 %v769_v15 }
 0x3e6   :  { %v905_v19 = vpop.eup %904 }
 0x3e7   :  { %v907_v21 = vpop.eup %906 }
 0x3e8   :  { %v776_v22 = vcombine.low %v905_v19, %v907_v21 }
 0x3ea   :  { %v783_v23 = vrot.slane %v776_v22, %v782_v20 }
 0x3ec   :  { %v790_v24 = vrot.slane %v783_v23, %v782_v20 }
 0x3ee   :  { %796 = vst.msk [vmem:[#allocation3] sm:$0x3] %vm794_vm3, %v790_v24 }
 0x3ef   :  { %919 = shalt.err (!%p916_p4)
}
 0x3f0   :  { %s920_s20 = scalar_lea.hbm %s1229_s9, 32 }
 0x3f1   :  { %p921_p5 = scmp.ne.s32.totalorder %s1229_s9, %s920_s20  ;;  %p924_p6 = scmp.lt.u32.totalorder %s920_s20, %s1229_s9 }
 0x3f3   :  { %p926_p7 = pnand %p924_p6, %p921_p5 }
 0x3f5   :  { %929 = shalt.err (!%p926_p7)
}
 0x3f6   :  { %806 = dma.vmem_to_hbm [thread:$0]  %s804_s17, 32, %s1229_s9, [#allocation4]  }
 0x3f7   :  { %930 = dma.done.wait [#allocation4], 32  }
 0x3f8   :  { %931 = vsyncadd [#allocation4], 4294967264 }
 0x3f9   :  { %810 = vsyncpa [#allocation4], 1 }

</bundles_post_ra>
